<compile_context>
chip_gen: v7x
topology: tpu7x:2x2x1
jax: 0.10.0
libtpu: 0.0.40
codegen_flags: <defaults>
</compile_context>

<pallas_src>
import jax
import jax.numpy as jnp
from jax.experimental import pallas as pl
from jax.experimental.pallas import tpu as pltpu

LAMB_DICE = 1.0
LAMB_CE = 1.0
SMOOTH = 1e-5
LANE = 128
SUB = 8

# TODO(synk): class `weight` path of DiceCE (weighted dice + weighted CE) is not
#             implemented; only the weight=None configuration is translated.


def _dice_ce_kernel(pred_ref, lab_ref, inter_ref, union_ref, ce_ref):
    s = pl.program_id(1)

    @pl.when(s == 0)
    def _init():
        inter_ref[...] = jnp.zeros_like(inter_ref)
        union_ref[...] = jnp.zeros_like(union_ref)
        ce_ref[...] = jnp.zeros_like(ce_ref)

    x = pred_ref[0].astype(jnp.float32)        # (C, R, 128) upcast after DMA
    lab = lab_ref[0, 0].astype(jnp.int32)      # (R, 128)
    C, R, L = x.shape

    valid = lab < C                            # padded pixels carry label == C
    valid_f = valid.astype(jnp.float32)

    # Numerically stable softmax over the (leading) class axis: reductions are
    # elementwise VPU ops over full vregs, no XLU sublane work.
    m = jnp.max(x, axis=0)                     # (R, 128)
    e = jnp.exp(x - m[None, :, :])             # (C, R, 128)   (EUP)
    se = jnp.sum(e, axis=0)                    # (R, 128)
    # EUP approximate reciprocal + one Newton step (~f32 accuracy): the
    # per-element softmax divide becomes a multiply.
    inv = pl.reciprocal(se, approx=True)
    inv = inv * (2.0 - se * inv)
    logsumexp = m + jnp.log(se)                # (R, 128)

    def fold(v):
        # (R, 128) -> (8, 128): tile-aligned regroup + elementwise vreg adds.
        # The cross-lane collapse happens once, outside the kernel.
        return jnp.sum(v.reshape(R // SUB, SUB, L), axis=0)

    # Unrolled loop over classes (C is small & static): avoids materialising a
    # (C, R, 128) int32 iota + f32 one-hot.  One boolean mask per class is
    # reused for the dice intersection, the one-hot count and the CE logit.
    logit_t = jnp.zeros((R, L), jnp.float32)
    for c in range(C):
        mask = lab == c
        mask_f = mask.astype(jnp.float32)
        p_c = e[c] * inv                       # softmax prob of class c
        inter_ref[0, c] += fold(p_c * mask_f)
        union_ref[0, c] += fold(p_c * p_c * valid_f + mask_f)
        logit_t = logit_t + jnp.where(mask, x[c], 0.0)

    # Cross entropy: -log_softmax at the target = logsumexp - logit_target.
    ce_ref[0] += fold(jnp.where(valid, logsumexp - logit_t, 0.0))


def dice_ce_loss(pred, labels, *, lamb_dice=LAMB_DICE, lamb_ce=LAMB_CE):
    """pred: [N, C, H, W] float (f32/bf16), labels: [N, H, W] int -> scalar f32."""
    N, C, H, W = pred.shape
    S = H * W

    # ---- choose the spatial tile (rows of 128 lanes) ------------------------
    rows = (S + LANE - 1) // LANE
    itemsize = jnp.dtype(pred.dtype).itemsize
    # Keep the double-buffered logit stream around ~6 MiB so tiles plus the
    # in-kernel f32 temporaries stay comfortably inside scoped VMEM on every
    # generation (v7x: 64 MiB physical, 32 MiB default scoped).
    stream_budget = 6 * 1024 * 1024
    max_rows = max(SUB, stream_budget // (2 * C * LANE * itemsize))
    rows_r8 = ((rows + SUB - 1) // SUB) * SUB
    tile_rows = min(512, max_rows, rows_r8)
    tile_rows = max(SUB, (tile_rows // SUB) * SUB)

    rows_pad = ((rows + tile_rows - 1) // tile_rows) * tile_rows
    s_pad = rows_pad * LANE

    # No dtype cast of pred here (would double HBM traffic); kernel upcasts.
    pred3 = pred.reshape(N, C, S)
    lab3 = labels.reshape(N, 1, S)
    if lab3.dtype != jnp.int32:
        lab3 = lab3.astype(jnp.int32)
    # TODO(synk): callers could pass uint8/int16 labels to cut HBM traffic further.
    if s_pad != S:
        pred3 = jnp.pad(pred3, ((0, 0), (0, 0), (0, s_pad - S)))
        lab3 = jnp.pad(lab3, ((0, 0), (0, 0), (0, s_pad - S)),
                       constant_values=C)      # label == C -> masked out in-kernel
    pred4 = pred3.reshape(N, C, rows_pad, LANE)
    lab4 = lab3.reshape(N, 1, rows_pad, LANE)

    grid = (N, rows_pad // tile_rows)

    inter_out, union_out, ce_out = pl.pallas_call(
        _dice_ce_kernel,
        out_shape=(
            jax.ShapeDtypeStruct((N, C, SUB, LANE), jnp.float32),
            jax.ShapeDtypeStruct((N, C, SUB, LANE), jnp.float32),
            jax.ShapeDtypeStruct((N, SUB, LANE), jnp.float32),
        ),
        grid_spec=pltpu.PrefetchScalarGridSpec(
            num_scalar_prefetch=0,
            grid=grid,
            in_specs=[
                pl.BlockSpec((1, C, tile_rows, LANE), lambda n, s: (n, 0, s, 0)),
                pl.BlockSpec((1, 1, tile_rows, LANE), lambda n, s: (n, 0, s, 0)),
            ],
            out_specs=[
                pl.BlockSpec((1, C, SUB, LANE), lambda n, s: (n, 0, 0, 0)),
                pl.BlockSpec((1, C, SUB, LANE), lambda n, s: (n, 0, 0, 0)),
                pl.BlockSpec((1, SUB, LANE), lambda n, s: (n, 0, 0)),
            ],
        ),
        compiler_params=pltpu.CompilerParams(
            # Batch axis is independent (per-n output blocks) -> megacore
            # parallel on v7x; spatial axis is the accumulation axis.
            dimension_semantics=("parallel", "arbitrary"),
            vmem_limit_bytes=48 * 1024 * 1024,
        ),
    )(pred4, lab4)

    # Tiny final reductions + scalar combine in plain JAX.
    inter = jnp.sum(inter_out, axis=(2, 3))            # (N, C)
    union = jnp.sum(union_out, axis=(2, 3))            # (N, C)
    dice_coef = (2.0 * inter + SMOOTH) / (union + SMOOTH)
    dice_loss = 1.0 - jnp.mean(dice_coef)
    ce_loss = jnp.sum(ce_out) / (N * S)                # mean over real pixels only
    return lamb_dice * dice_loss + lamb_ce * ce_loss


def dice_ce_reference(pred, labels, lamb_dice=LAMB_DICE, lamb_ce=LAMB_CE):
    """Pure-JAX reference matching the PyTorch semantics (weight=None)."""
    N, C, H, W = pred.shape
    S = H * W
    logits = pred.reshape(N, C, S).astype(jnp.float32)
    lab = labels.reshape(N, S)
    p = jax.nn.softmax(logits, axis=1)
    onehot = jax.nn.one_hot(lab, C, axis=1, dtype=jnp.float32)   # (N, C, S)
    inter = jnp.sum(p * onehot, axis=2)
    union = jnp.sum(p * p, axis=2) + jnp.sum(onehot, axis=2)
    dice_coef = (2.0 * inter + SMOOTH) / (union + SMOOTH)
    dice_loss = 1.0 - jnp.mean(dice_coef)
    logp = jax.nn.log_softmax(logits, axis=1)
    ce_loss = -jnp.mean(jnp.sum(logp * onehot, axis=1))
    return lamb_dice * dice_loss + lamb_ce * ce_loss


if __name__ == "__main__":
    key = jax.random.PRNGKey(0)
    kp, kl = jax.random.split(key)
    N, C, H, W = 2, 4, 16, 16
    pred = jax.random.normal(kp, (N, C, H, W), dtype=jnp.float32)
    labels = jax.random.randint(kl, (N, H, W), 0, C, dtype=jnp.int32)

    loss = jax.block_until_ready(dice_ce_loss(pred, labels))
    ref = jax.block_until_ready(dice_ce_reference(pred, labels))
    assert jnp.allclose(loss, ref, rtol=1e-3, atol=1e-4), (loss, ref)

    print("KERNEL_OK")
</pallas_src>

<mosaic_0001>
module attributes {stable_mosaic.version = 11 : i64} {
  func.func @_dice_ce_kernel(%arg0: i32, %arg1: i32, %arg2: memref<1x4x8x128xf32, #tpu.memory_space<vmem>>, %arg3: memref<1x1x8x128xi32, #tpu.memory_space<vmem>>, %arg4: memref<1x4x8x128xf32, #tpu.memory_space<vmem>>, %arg5: memref<1x4x8x128xf32, #tpu.memory_space<vmem>>, %arg6: memref<1x8x128xf32, #tpu.memory_space<vmem>>) attributes {dimension_semantics = [#tpu.dimension_semantics<parallel>, #tpu.dimension_semantics<arbitrary>], iteration_bounds = array<i64: 2, 1>, scalar_prefetch = 0 : i64, scratch_operands = 0 : i64, tpu.core_type = #tpu.core_type<tc>, window_params = [{transform_indices = @transform_0, window_bounds = array<i64: 1, 4, 8, 128>}, {transform_indices = @transform_1, window_bounds = array<i64: 1, 1, 8, 128>}, {transform_indices = @transform_2, window_bounds = array<i64: 1, 4, 8, 128>}, {transform_indices = @transform_3, window_bounds = array<i64: 1, 4, 8, 128>}, {transform_indices = @transform_4, window_bounds = array<i64: 1, 8, 128>}]} {
    %c0_i32 = arith.constant 0 : i32
    %0 = arith.cmpi eq, %arg1, %c0_i32 : i32
    %1 = arith.extui %0 : i1 to i32
    %c0_i32_0 = arith.constant 0 : i32
    %2 = arith.cmpi ne, %1, %c0_i32_0 : i32
    scf.if %2 {
      %cst_93 = arith.constant 0.000000e+00 : f32
      %164 = vector.broadcast %cst_93 : f32 to vector<1x4x8x128xf32>
      %c0_94 = arith.constant 0 : index
      %c0_95 = arith.constant 0 : index
      %c0_96 = arith.constant 0 : index
      %c0_97 = arith.constant 0 : index
      %165 = vector.load %arg4[%c0_94, %c0_95, %c0_96, %c0_97] : memref<1x4x8x128xf32, #tpu.memory_space<vmem>>, vector<1x4x8x128xf32>
      tpu.vector_store %arg4[%c0_94, %c0_95, %c0_96, %c0_97], %164 {strides = array<i32>} : memref<1x4x8x128xf32, #tpu.memory_space<vmem>>, vector<1x4x8x128xf32>,
      %cst_98 = arith.constant 0.000000e+00 : f32
      %166 = vector.broadcast %cst_98 : f32 to vector<1x4x8x128xf32>
      %c0_99 = arith.constant 0 : index
      %c0_100 = arith.constant 0 : index
      %c0_101 = arith.constant 0 : index
      %c0_102 = arith.constant 0 : index
      %167 = vector.load %arg5[%c0_99, %c0_100, %c0_101, %c0_102] : memref<1x4x8x128xf32, #tpu.memory_space<vmem>>, vector<1x4x8x128xf32>
      tpu.vector_store %arg5[%c0_99, %c0_100, %c0_101, %c0_102], %166 {strides = array<i32>} : memref<1x4x8x128xf32, #tpu.memory_space<vmem>>, vector<1x4x8x128xf32>,
      %cst_103 = arith.constant 0.000000e+00 : f32
      %168 = vector.broadcast %cst_103 : f32 to vector<1x8x128xf32>
      %c0_104 = arith.constant 0 : index
      %c0_105 = arith.constant 0 : index
      %c0_106 = arith.constant 0 : index
      %169 = vector.load %arg6[%c0_104, %c0_105, %c0_106] : memref<1x8x128xf32, #tpu.memory_space<vmem>>, vector<1x8x128xf32>
      tpu.vector_store %arg6[%c0_104, %c0_105, %c0_106], %168 {strides = array<i32>} : memref<1x8x128xf32, #tpu.memory_space<vmem>>, vector<1x8x128xf32>,
    } else {
    }
    %c0 = arith.constant 0 : index
    %c0_1 = arith.constant 0 : index
    %c0_2 = arith.constant 0 : index
    %c0_3 = arith.constant 0 : index
    %3 = vector.load %arg2[%c0, %c0_1, %c0_2, %c0_3] : memref<1x4x8x128xf32, #tpu.memory_space<vmem>>, vector<1x4x8x128xf32>
    %4 = vector.shape_cast %3 : vector<1x4x8x128xf32> to vector<4x8x128xf32>
    %c0_4 = arith.constant 0 : index
    %c0_5 = arith.constant 0 : index
    %c0_6 = arith.constant 0 : index
    %c0_7 = arith.constant 0 : index
    %5 = vector.load %arg3[%c0_4, %c0_5, %c0_6, %c0_7] : memref<1x1x8x128xi32, #tpu.memory_space<vmem>>, vector<1x1x8x128xi32>
    %6 = vector.shape_cast %5 : vector<1x1x8x128xi32> to vector<8x128xi32>
    %c4_i32 = arith.constant 4 : i32
    %7 = vector.broadcast %c4_i32 : i32 to vector<8x128xi32>
    %8 = arith.cmpi slt, %6, %7 : vector<8x128xi32>
    %9 = arith.extui %8 : vector<8x128xi1> to vector<8x128xi32>
    %10 = arith.sitofp %9 : vector<8x128xi32> to vector<8x128xf32>
    %cst = arith.constant dense<0xFF800000> : vector<8x128xf32>
    %11 = vector.multi_reduction <maximumf>, %4, %cst [0] : vector<4x8x128xf32> to vector<8x128xf32>
    %12 = vector.shape_cast %11 : vector<8x128xf32> to vector<1x8x128xf32>
    %13 = vector.broadcast %12 : vector<1x8x128xf32> to vector<4x8x128xf32>
    %14 = arith.subf %4, %13 : vector<4x8x128xf32>
    %15 = math.exp %14 : vector<4x8x128xf32>
    %cst_8 = arith.constant dense<0.000000e+00> : vector<8x128xf32>
    %16 = vector.multi_reduction <add>, %15, %cst_8 [0] : vector<4x8x128xf32> to vector<8x128xf32>
    %17 = tpu.reciprocal %16 {approx = true} : vector<8x128xf32> -> vector<8x128xf32>
    %18 = arith.mulf %16, %17 : vector<8x128xf32>
    %cst_9 = arith.constant 2.000000e+00 : f32
    %19 = vector.broadcast %cst_9 : f32 to vector<8x128xf32>
    %20 = arith.subf %19, %18 : vector<8x128xf32>
    %21 = arith.mulf %17, %20 : vector<8x128xf32>
    %22 = math.log %16 : vector<8x128xf32>
    %23 = arith.addf %11, %22 : vector<8x128xf32>
    %cst_10 = arith.constant 0.000000e+00 : f32
    %24 = vector.broadcast %cst_10 : f32 to vector<8x128xf32>
    %c0_i32_11 = arith.constant 0 : i32
    %25 = vector.broadcast %c0_i32_11 : i32 to vector<8x128xi32>
    %26 = arith.cmpi eq, %6, %25 : vector<8x128xi32>
    %27 = arith.extui %26 : vector<8x128xi1> to vector<8x128xi32>
    %28 = arith.sitofp %27 : vector<8x128xi32> to vector<8x128xf32>
    %29 = vector.extract_strided_slice %15 {offsets = [0, 0, 0], sizes = [1, 8, 128], strides = [1, 1, 1]} : vector<4x8x128xf32> to vector<1x8x128xf32>
    %30 = vector.shape_cast %29 : vector<1x8x128xf32> to vector<8x128xf32>
    %31 = arith.mulf %30, %21 : vector<8x128xf32>
    %c0_12 = arith.constant 0 : index
    %c0_13 = arith.constant 0 : index
    %c0_14 = arith.constant 0 : index
    %c0_15 = arith.constant 0 : index
    %32 = vector.load %arg4[%c0_12, %c0_13, %c0_14, %c0_15] : memref<1x4x8x128xf32, #tpu.memory_space<vmem>>, vector<1x1x8x128xf32>
    %33 = vector.shape_cast %32 : vector<1x1x8x128xf32> to vector<8x128xf32>
    %34 = arith.mulf %31, %28 : vector<8x128xf32>
    %35 = vector.shape_cast %34 : vector<8x128xf32> to vector<1x8x128xf32>
    %cst_16 = arith.constant dense<0.000000e+00> : vector<8x128xf32>
    %36 = vector.multi_reduction <add>, %35, %cst_16 [0] : vector<1x8x128xf32> to vector<8x128xf32>
    %37 = arith.addf %33, %36 : vector<8x128xf32>
    %c0_17 = arith.constant 0 : index
    %c0_18 = arith.constant 0 : index
    %c0_19 = arith.constant 0 : index
    %c0_20 = arith.constant 0 : index
    %38 = vector.load %arg4[%c0_17, %c0_18, %c0_19, %c0_20] : memref<1x4x8x128xf32, #tpu.memory_space<vmem>>, vector<1x1x8x128xf32>
    %39 = vector.shape_cast %38 : vector<1x1x8x128xf32> to vector<8x128xf32>
    %40 = vector.shape_cast %37 : vector<8x128xf32> to vector<1x1x8x128xf32>
    tpu.vector_store %arg4[%c0_17, %c0_18, %c0_19, %c0_20], %40 {strides = array<i32>} : memref<1x4x8x128xf32, #tpu.memory_space<vmem>>, vector<1x1x8x128xf32>,
    %c0_21 = arith.constant 0 : index
    %c0_22 = arith.constant 0 : index
    %c0_23 = arith.constant 0 : index
    %c0_24 = arith.constant 0 : index
    %41 = vector.load %arg5[%c0_21, %c0_22, %c0_23, %c0_24] : memref<1x4x8x128xf32, #tpu.memory_space<vmem>>, vector<1x1x8x128xf32>
    %42 = vector.shape_cast %41 : vector<1x1x8x128xf32> to vector<8x128xf32>
    %43 = arith.mulf %31, %31 : vector<8x128xf32>
    %44 = arith.mulf %43, %10 : vector<8x128xf32>
    %45 = arith.addf %44, %28 : vector<8x128xf32>
    %46 = vector.shape_cast %45 : vector<8x128xf32> to vector<1x8x128xf32>
    %cst_25 = arith.constant dense<0.000000e+00> : vector<8x128xf32>
    %47 = vector.multi_reduction <add>, %46, %cst_25 [0] : vector<1x8x128xf32> to vector<8x128xf32>
    %48 = arith.addf %42, %47 : vector<8x128xf32>
    %c0_26 = arith.constant 0 : index
    %c0_27 = arith.constant 0 : index
    %c0_28 = arith.constant 0 : index
    %c0_29 = arith.constant 0 : index
    %49 = vector.load %arg5[%c0_26, %c0_27, %c0_28, %c0_29] : memref<1x4x8x128xf32, #tpu.memory_space<vmem>>, vector<1x1x8x128xf32>
    %50 = vector.shape_cast %49 : vector<1x1x8x128xf32> to vector<8x128xf32>
    %51 = vector.shape_cast %48 : vector<8x128xf32> to vector<1x1x8x128xf32>
    tpu.vector_store %arg5[%c0_26, %c0_27, %c0_28, %c0_29], %51 {strides = array<i32>} : memref<1x4x8x128xf32, #tpu.memory_space<vmem>>, vector<1x1x8x128xf32>,
    %52 = vector.extract_strided_slice %4 {offsets = [0, 0, 0], sizes = [1, 8, 128], strides = [1, 1, 1]} : vector<4x8x128xf32> to vector<1x8x128xf32>
    %53 = vector.shape_cast %52 : vector<1x8x128xf32> to vector<8x128xf32>
    %cst_30 = arith.constant 0.000000e+00 : f32
    %54 = vector.broadcast %cst_30 : f32 to vector<8x128xf32>
    %55 = arith.select %26, %53, %54 : vector<8x128xi1>, vector<8x128xf32>
    %56 = arith.addf %24, %55 : vector<8x128xf32>
    %c1_i32 = arith.constant 1 : i32
    %57 = vector.broadcast %c1_i32 : i32 to vector<8x128xi32>
    %58 = arith.cmpi eq, %6, %57 : vector<8x128xi32>
    %59 = arith.extui %58 : vector<8x128xi1> to vector<8x128xi32>
    %60 = arith.sitofp %59 : vector<8x128xi32> to vector<8x128xf32>
    %61 = vector.extract_strided_slice %15 {offsets = [1, 0, 0], sizes = [1, 8, 128], strides = [1, 1, 1]} : vector<4x8x128xf32> to vector<1x8x128xf32>
    %62 = vector.shape_cast %61 : vector<1x8x128xf32> to vector<8x128xf32>
    %63 = arith.mulf %62, %21 : vector<8x128xf32>
    %c0_31 = arith.constant 0 : index
    %c1 = arith.constant 1 : index
    %c0_32 = arith.constant 0 : index
    %c0_33 = arith.constant 0 : index
    %64 = vector.load %arg4[%c0_31, %c1, %c0_32, %c0_33] : memref<1x4x8x128xf32, #tpu.memory_space<vmem>>, vector<1x1x8x128xf32>
    %65 = vector.shape_cast %64 : vector<1x1x8x128xf32> to vector<8x128xf32>
    %66 = arith.mulf %63, %60 : vector<8x128xf32>
    %67 = vector.shape_cast %66 : vector<8x128xf32> to vector<1x8x128xf32>
    %cst_34 = arith.constant dense<0.000000e+00> : vector<8x128xf32>
    %68 = vector.multi_reduction <add>, %67, %cst_34 [0] : vector<1x8x128xf32> to vector<8x128xf32>
    %69 = arith.addf %65, %68 : vector<8x128xf32>
    %c0_35 = arith.constant 0 : index
    %c1_36 = arith.constant 1 : index
    %c0_37 = arith.constant 0 : index
    %c0_38 = arith.constant 0 : index
    %70 = vector.load %arg4[%c0_35, %c1_36, %c0_37, %c0_38] : memref<1x4x8x128xf32, #tpu.memory_space<vmem>>, vector<1x1x8x128xf32>
    %71 = vector.shape_cast %70 : vector<1x1x8x128xf32> to vector<8x128xf32>
    %72 = vector.shape_cast %69 : vector<8x128xf32> to vector<1x1x8x128xf32>
    tpu.vector_store %arg4[%c0_35, %c1_36, %c0_37, %c0_38], %72 {strides = array<i32>} : memref<1x4x8x128xf32, #tpu.memory_space<vmem>>, vector<1x1x8x128xf32>,
    %c0_39 = arith.constant 0 : index
    %c1_40 = arith.constant 1 : index
    %c0_41 = arith.constant 0 : index
    %c0_42 = arith.constant 0 : index
    %73 = vector.load %arg5[%c0_39, %c1_40, %c0_41, %c0_42] : memref<1x4x8x128xf32, #tpu.memory_space<vmem>>, vector<1x1x8x128xf32>
    %74 = vector.shape_cast %73 : vector<1x1x8x128xf32> to vector<8x128xf32>
    %75 = arith.mulf %63, %63 : vector<8x128xf32>
    %76 = arith.mulf %75, %10 : vector<8x128xf32>
    %77 = arith.addf %76, %60 : vector<8x128xf32>
    %78 = vector.shape_cast %77 : vector<8x128xf32> to vector<1x8x128xf32>
    %cst_43 = arith.constant dense<0.000000e+00> : vector<8x128xf32>
    %79 = vector.multi_reduction <add>, %78, %cst_43 [0] : vector<1x8x128xf32> to vector<8x128xf32>
    %80 = arith.addf %74, %79 : vector<8x128xf32>
    %c0_44 = arith.constant 0 : index
    %c1_45 = arith.constant 1 : index
    %c0_46 = arith.constant 0 : index
    %c0_47 = arith.constant 0 : index
    %81 = vector.load %arg5[%c0_44, %c1_45, %c0_46, %c0_47] : memref<1x4x8x128xf32, #tpu.memory_space<vmem>>, vector<1x1x8x128xf32>
    %82 = vector.shape_cast %81 : vector<1x1x8x128xf32> to vector<8x128xf32>
    %83 = vector.shape_cast %80 : vector<8x128xf32> to vector<1x1x8x128xf32>
    tpu.vector_store %arg5[%c0_44, %c1_45, %c0_46, %c0_47], %83 {strides = array<i32>} : memref<1x4x8x128xf32, #tpu.memory_space<vmem>>, vector<1x1x8x128xf32>,
    %84 = vector.extract_strided_slice %4 {offsets = [1, 0, 0], sizes = [1, 8, 128], strides = [1, 1, 1]} : vector<4x8x128xf32> to vector<1x8x128xf32>
    %85 = vector.shape_cast %84 : vector<1x8x128xf32> to vector<8x128xf32>
    %cst_48 = arith.constant 0.000000e+00 : f32
    %86 = vector.broadcast %cst_48 : f32 to vector<8x128xf32>
    %87 = arith.select %58, %85, %86 : vector<8x128xi1>, vector<8x128xf32>
    %88 = arith.addf %56, %87 : vector<8x128xf32>
    %c2_i32 = arith.constant 2 : i32
    %89 = vector.broadcast %c2_i32 : i32 to vector<8x128xi32>
    %90 = arith.cmpi eq, %6, %89 : vector<8x128xi32>
    %91 = arith.extui %90 : vector<8x128xi1> to vector<8x128xi32>
    %92 = arith.sitofp %91 : vector<8x128xi32> to vector<8x128xf32>
    %93 = vector.extract_strided_slice %15 {offsets = [2, 0, 0], sizes = [1, 8, 128], strides = [1, 1, 1]} : vector<4x8x128xf32> to vector<1x8x128xf32>
    %94 = vector.shape_cast %93 : vector<1x8x128xf32> to vector<8x128xf32>
    %95 = arith.mulf %94, %21 : vector<8x128xf32>
    %c0_49 = arith.constant 0 : index
    %c2 = arith.constant 2 : index
    %c0_50 = arith.constant 0 : index
    %c0_51 = arith.constant 0 : index
    %96 = vector.load %arg4[%c0_49, %c2, %c0_50, %c0_51] : memref<1x4x8x128xf32, #tpu.memory_space<vmem>>, vector<1x1x8x128xf32>
    %97 = vector.shape_cast %96 : vector<1x1x8x128xf32> to vector<8x128xf32>
    %98 = arith.mulf %95, %92 : vector<8x128xf32>
    %99 = vector.shape_cast %98 : vector<8x128xf32> to vector<1x8x128xf32>
    %cst_52 = arith.constant dense<0.000000e+00> : vector<8x128xf32>
    %100 = vector.multi_reduction <add>, %99, %cst_52 [0] : vector<1x8x128xf32> to vector<8x128xf32>
    %101 = arith.addf %97, %100 : vector<8x128xf32>
    %c0_53 = arith.constant 0 : index
    %c2_54 = arith.constant 2 : index
    %c0_55 = arith.constant 0 : index
    %c0_56 = arith.constant 0 : index
    %102 = vector.load %arg4[%c0_53, %c2_54, %c0_55, %c0_56] : memref<1x4x8x128xf32, #tpu.memory_space<vmem>>, vector<1x1x8x128xf32>
    %103 = vector.shape_cast %102 : vector<1x1x8x128xf32> to vector<8x128xf32>
    %104 = vector.shape_cast %101 : vector<8x128xf32> to vector<1x1x8x128xf32>
    tpu.vector_store %arg4[%c0_53, %c2_54, %c0_55, %c0_56], %104 {strides = array<i32>} : memref<1x4x8x128xf32, #tpu.memory_space<vmem>>, vector<1x1x8x128xf32>,
    %c0_57 = arith.constant 0 : index
    %c2_58 = arith.constant 2 : index
    %c0_59 = arith.constant 0 : index
    %c0_60 = arith.constant 0 : index
    %105 = vector.load %arg5[%c0_57, %c2_58, %c0_59, %c0_60] : memref<1x4x8x128xf32, #tpu.memory_space<vmem>>, vector<1x1x8x128xf32>
    %106 = vector.shape_cast %105 : vector<1x1x8x128xf32> to vector<8x128xf32>
    %107 = arith.mulf %95, %95 : vector<8x128xf32>
    %108 = arith.mulf %107, %10 : vector<8x128xf32>
    %109 = arith.addf %108, %92 : vector<8x128xf32>
    %110 = vector.shape_cast %109 : vector<8x128xf32> to vector<1x8x128xf32>
    %cst_61 = arith.constant dense<0.000000e+00> : vector<8x128xf32>
    %111 = vector.multi_reduction <add>, %110, %cst_61 [0] : vector<1x8x128xf32> to vector<8x128xf32>
    %112 = arith.addf %106, %111 : vector<8x128xf32>
    %c0_62 = arith.constant 0 : index
    %c2_63 = arith.constant 2 : index
    %c0_64 = arith.constant 0 : index
    %c0_65 = arith.constant 0 : index
    %113 = vector.load %arg5[%c0_62, %c2_63, %c0_64, %c0_65] : memref<1x4x8x128xf32, #tpu.memory_space<vmem>>, vector<1x1x8x128xf32>
    %114 = vector.shape_cast %113 : vector<1x1x8x128xf32> to vector<8x128xf32>
    %115 = vector.shape_cast %112 : vector<8x128xf32> to vector<1x1x8x128xf32>
    tpu.vector_store %arg5[%c0_62, %c2_63, %c0_64, %c0_65], %115 {strides = array<i32>} : memref<1x4x8x128xf32, #tpu.memory_space<vmem>>, vector<1x1x8x128xf32>,
    %116 = vector.extract_strided_slice %4 {offsets = [2, 0, 0], sizes = [1, 8, 128], strides = [1, 1, 1]} : vector<4x8x128xf32> to vector<1x8x128xf32>
    %117 = vector.shape_cast %116 : vector<1x8x128xf32> to vector<8x128xf32>
    %cst_66 = arith.constant 0.000000e+00 : f32
    %118 = vector.broadcast %cst_66 : f32 to vector<8x128xf32>
    %119 = arith.select %90, %117, %118 : vector<8x128xi1>, vector<8x128xf32>
    %120 = arith.addf %88, %119 : vector<8x128xf32>
    %c3_i32 = arith.constant 3 : i32
    %121 = vector.broadcast %c3_i32 : i32 to vector<8x128xi32>
    %122 = arith.cmpi eq, %6, %121 : vector<8x128xi32>
    %123 = arith.extui %122 : vector<8x128xi1> to vector<8x128xi32>
    %124 = arith.sitofp %123 : vector<8x128xi32> to vector<8x128xf32>
    %125 = vector.extract_strided_slice %15 {offsets = [3, 0, 0], sizes = [1, 8, 128], strides = [1, 1, 1]} : vector<4x8x128xf32> to vector<1x8x128xf32>
    %126 = vector.shape_cast %125 : vector<1x8x128xf32> to vector<8x128xf32>
    %127 = arith.mulf %126, %21 : vector<8x128xf32>
    %c0_67 = arith.constant 0 : index
    %c3 = arith.constant 3 : index
    %c0_68 = arith.constant 0 : index
    %c0_69 = arith.constant 0 : index
    %128 = vector.load %arg4[%c0_67, %c3, %c0_68, %c0_69] : memref<1x4x8x128xf32, #tpu.memory_space<vmem>>, vector<1x1x8x128xf32>
    %129 = vector.shape_cast %128 : vector<1x1x8x128xf32> to vector<8x128xf32>
    %130 = arith.mulf %127, %124 : vector<8x128xf32>
    %131 = vector.shape_cast %130 : vector<8x128xf32> to vector<1x8x128xf32>
    %cst_70 = arith.constant dense<0.000000e+00> : vector<8x128xf32>
    %132 = vector.multi_reduction <add>, %131, %cst_70 [0] : vector<1x8x128xf32> to vector<8x128xf32>
    %133 = arith.addf %129, %132 : vector<8x128xf32>
    %c0_71 = arith.constant 0 : index
    %c3_72 = arith.constant 3 : index
    %c0_73 = arith.constant 0 : index
    %c0_74 = arith.constant 0 : index
    %134 = vector.load %arg4[%c0_71, %c3_72, %c0_73, %c0_74] : memref<1x4x8x128xf32, #tpu.memory_space<vmem>>, vector<1x1x8x128xf32>
    %135 = vector.shape_cast %134 : vector<1x1x8x128xf32> to vector<8x128xf32>
    %136 = vector.shape_cast %133 : vector<8x128xf32> to vector<1x1x8x128xf32>
    tpu.vector_store %arg4[%c0_71, %c3_72, %c0_73, %c0_74], %136 {strides = array<i32>} : memref<1x4x8x128xf32, #tpu.memory_space<vmem>>, vector<1x1x8x128xf32>,
    %c0_75 = arith.constant 0 : index
    %c3_76 = arith.constant 3 : index
    %c0_77 = arith.constant 0 : index
    %c0_78 = arith.constant 0 : index
    %137 = vector.load %arg5[%c0_75, %c3_76, %c0_77, %c0_78] : memref<1x4x8x128xf32, #tpu.memory_space<vmem>>, vector<1x1x8x128xf32>
    %138 = vector.shape_cast %137 : vector<1x1x8x128xf32> to vector<8x128xf32>
    %139 = arith.mulf %127, %127 : vector<8x128xf32>
    %140 = arith.mulf %139, %10 : vector<8x128xf32>
    %141 = arith.addf %140, %124 : vector<8x128xf32>
    %142 = vector.shape_cast %141 : vector<8x128xf32> to vector<1x8x128xf32>
    %cst_79 = arith.constant dense<0.000000e+00> : vector<8x128xf32>
    %143 = vector.multi_reduction <add>, %142, %cst_79 [0] : vector<1x8x128xf32> to vector<8x128xf32>
    %144 = arith.addf %138, %143 : vector<8x128xf32>
    %c0_80 = arith.constant 0 : index
    %c3_81 = arith.constant 3 : index
    %c0_82 = arith.constant 0 : index
    %c0_83 = arith.constant 0 : index
    %145 = vector.load %arg5[%c0_80, %c3_81, %c0_82, %c0_83] : memref<1x4x8x128xf32, #tpu.memory_space<vmem>>, vector<1x1x8x128xf32>
    %146 = vector.shape_cast %145 : vector<1x1x8x128xf32> to vector<8x128xf32>
    %147 = vector.shape_cast %144 : vector<8x128xf32> to vector<1x1x8x128xf32>
    tpu.vector_store %arg5[%c0_80, %c3_81, %c0_82, %c0_83], %147 {strides = array<i32>} : memref<1x4x8x128xf32, #tpu.memory_space<vmem>>, vector<1x1x8x128xf32>,
    %148 = vector.extract_strided_slice %4 {offsets = [3, 0, 0], sizes = [1, 8, 128], strides = [1, 1, 1]} : vector<4x8x128xf32> to vector<1x8x128xf32>
    %149 = vector.shape_cast %148 : vector<1x8x128xf32> to vector<8x128xf32>
    %cst_84 = arith.constant 0.000000e+00 : f32
    %150 = vector.broadcast %cst_84 : f32 to vector<8x128xf32>
    %151 = arith.select %122, %149, %150 : vector<8x128xi1>, vector<8x128xf32>
    %152 = arith.addf %120, %151 : vector<8x128xf32>
    %c0_85 = arith.constant 0 : index
    %c0_86 = arith.constant 0 : index
    %c0_87 = arith.constant 0 : index
    %153 = vector.load %arg6[%c0_85, %c0_86, %c0_87] : memref<1x8x128xf32, #tpu.memory_space<vmem>>, vector<1x8x128xf32>
    %154 = vector.shape_cast %153 : vector<1x8x128xf32> to vector<8x128xf32>
    %155 = arith.subf %23, %152 : vector<8x128xf32>
    %cst_88 = arith.constant 0.000000e+00 : f32
    %156 = vector.broadcast %cst_88 : f32 to vector<8x128xf32>
    %157 = arith.select %8, %155, %156 : vector<8x128xi1>, vector<8x128xf32>
    %158 = vector.shape_cast %157 : vector<8x128xf32> to vector<1x8x128xf32>
    %cst_89 = arith.constant dense<0.000000e+00> : vector<8x128xf32>
    %159 = vector.multi_reduction <add>, %158, %cst_89 [0] : vector<1x8x128xf32> to vector<8x128xf32>
    %160 = arith.addf %154, %159 : vector<8x128xf32>
    %c0_90 = arith.constant 0 : index
    %c0_91 = arith.constant 0 : index
    %c0_92 = arith.constant 0 : index
    %161 = vector.load %arg6[%c0_90, %c0_91, %c0_92] : memref<1x8x128xf32, #tpu.memory_space<vmem>>, vector<1x8x128xf32>
    %162 = vector.shape_cast %161 : vector<1x8x128xf32> to vector<8x128xf32>
    %163 = vector.shape_cast %160 : vector<8x128xf32> to vector<1x8x128xf32>
    tpu.vector_store %arg6[%c0_90, %c0_91, %c0_92], %163 {strides = array<i32>} : memref<1x8x128xf32, #tpu.memory_space<vmem>>, vector<1x8x128xf32>,
    return
  }
  func.func @transform_0(%arg0: i32, %arg1: i32) -> (i32, i32, i32, i32) {
    %c0_i32 = arith.constant 0 : i32
    %c0_i32_0 = arith.constant 0 : i32
    %c0_i32_1 = arith.constant 0 : i32
    return %arg0, %c0_i32, %arg1, %c0_i32_0 : i32, i32, i32, i32
  }
  func.func @transform_1(%arg0: i32, %arg1: i32) -> (i32, i32, i32, i32) {
    %c0_i32 = arith.constant 0 : i32
    %c0_i32_0 = arith.constant 0 : i32
    %c0_i32_1 = arith.constant 0 : i32
    return %arg0, %c0_i32, %arg1, %c0_i32_0 : i32, i32, i32, i32
  }
  func.func @transform_2(%arg0: i32, %arg1: i32) -> (i32, i32, i32, i32) {
    %c0_i32 = arith.constant 0 : i32
    %c0_i32_0 = arith.constant 0 : i32
    %c0_i32_1 = arith.constant 0 : i32
    %c0_i32_2 = arith.constant 0 : i32
    return %arg0, %c0_i32, %c0_i32_0, %c0_i32_1 : i32, i32, i32, i32
  }
  func.func @transform_3(%arg0: i32, %arg1: i32) -> (i32, i32, i32, i32) {
    %c0_i32 = arith.constant 0 : i32
    %c0_i32_0 = arith.constant 0 : i32
    %c0_i32_1 = arith.constant 0 : i32
    %c0_i32_2 = arith.constant 0 : i32
    return %arg0, %c0_i32, %c0_i32_0, %c0_i32_1 : i32, i32, i32, i32
  }
  func.func @transform_4(%arg0: i32, %arg1: i32) -> (i32, i32, i32) {
    %c0_i32 = arith.constant 0 : i32
    %c0_i32_0 = arith.constant 0 : i32
    %c0_i32_1 = arith.constant 0 : i32
    return %arg0, %c0_i32, %c0_i32_0 : i32, i32, i32
  }
}

</mosaic_0001>

<bundles_post_ra>
// kernel: tpu_custom_call.1
= control target key start
LH: loop header
LB: loop body
LE: loop exit
PB: predicated region body
PF: predicated region fallthrough
CT: control target
= control target key end

     0   :  { %s1349_s0 = inlined_call_operand.hbm [shape: f32[2,4,8,128], index: 0, kind: input, shape index: {}]   ;;  %s1350_s1 = inlined_call_operand.hbm [shape: s32[2,1,8,128], index: 1, kind: input, shape index: {}]   ;;  %s1351_s2 = inlined_call_operand.hbm [shape: f32[2,4,8,128], index: 2, kind: output, shape index: {0}]   ;;  %s1352_s3 = inlined_call_operand.hbm [shape: f32[2,4,8,128], index: 3, kind: output, shape index: {1}]   ;;  %s1353_s4 = inlined_call_operand.hbm [shape: f32[2,8,128], index: 4, kind: output, shape index: {2}]  }
   0x1   :  { %1357 = sst [smem:[#allocation15_spill]] %s1349_s0 }
   0x2   :  { %1358 = sst [smem:[#allocation16_spill]] %s1350_s1 }
   0x3   :  { %10 = vsyncpa [#allocation3], 0 }
   0x4   :  { %12 = vsyncpa [#allocation3 + $0x1], 0 }
   0x5   :  { %13 = vsyncpa [#allocation6], 0 }
   0x6   :  { %15 = vsyncpa [#allocation6 + $0x1], 0 }
   0x7   :  { %16 = vsyncpa [#allocation4], 0 }
   0x8   :  { %18 = vsyncpa [#allocation4 + $0x1], 0 }
   0x9   :  { %19 = vsyncpa [#allocation9], 0 }
   0xa   :  { %21 = vsyncpa [#allocation9 + $0x1], 0  ;;  %s1022_s15 = smov 0   ;;  %s1024_s16 = smov 0  }
   0xb   :  { %s1026_s17 = smov 0   ;;  %s1028_s18 = smov 0  }
   0xc   :  { %s1030_s19 = smov 0   ;;  %s1032_s20 = smov 0  }
   0xd LB: > { %s1053_s21 = sadd.s32 4294967295, %s985_s20   ;;  %s1355_s22 = sadd.s32 4294967294, %s985_s20   ;;  %s985_s20 = sphi %s1032_s20, %s27_s20   ;;  %s981_s19 = sphi %s1030_s19, %s1381_s19   ;;  %s977_s18 = sphi %s1028_s18, %s1380_s18   ;;  %s973_s17 = sphi %s1026_s17, %s1379_s17   ;;  %s969_s16 = sphi %s1024_s16, %s1378_s16   ;;  %s965_s15 = sphi %s1022_s15, %s1377_s15  }
   0xe   : > { %s39_s23 = sadd.s32 1, %s981_s19  ;;  %s48_s24 = sadd.s32 1, %s973_s17 }
   0xf   : > { %p41_p0 = scmp.ge.s32.totalorder %s39_s23, 2  ;;  %p55_p1 = scmp.ne.s32.totalorder %s973_s17, %s969_s16 }
  0x10   : > { %p56_p2 = scmp.eq.s32.totalorder %s985_s20, 0  ;;  %p61_p3 = scmp.ne.s32.totalorder %s969_s16, %s965_s15 }
  0x11   : > { %s1383_s23 = smov (%p41_p0, %s39_s23), 0  ;;  %p62_p5 = scmp.eq.s32.totalorder %s1053_s21, 0 }
  0x12   : > { %p1065_p4 = por %p56_p2, %p55_p1  ;;  %s43_s26 = ssub.s32 %s981_s19, %s1383_s23 }
  0x13   : > { %p113_p6 = scmp.eq.s32.totalorder %s1053_s21, 1  ;;  %p46_p7 = scmp.eq.s32.totalorder %s43_s26, 0 }
  0x14   : > { %p1073_p8 = por %p62_p5, %p61_p3  ;;  %p119_p10 = scmp.eq.s32.totalorder %s1355_s22, 1 }
  0x15   : > { %p1077_p9 = por %p113_p6, %p55_p1  ;;  %p712_p13 = scmp.lt.s32.totalorder %s985_s20, 2 }
  0x16   : > { %s1360_s27 = scalar_select %p1073_p8, 1, 0 }
  0x17   : > { %s1361_s28 = scalar_select %p1077_p9, 1, 0 }
  0x18   : > { %s1084_s29 = scalar_select %p46_p7, %s973_s17, %s48_s24  }
  0x19   : > { %p1086_p11 = por %p119_p10, %p61_p3  ;;  %s1093_s5 = sand.u32 1, %s973_s17  }
  0x1a   : > { %s644_s6 = sshll.u32 %s1093_s5, 5  ;;  %s682_s7 = sshll.u32 %s981_s19, 9 }
  0x1b   : > { %s1362_s30 = scalar_select %p1086_p11, 1, 0 }
  0x1c   : > { %s1363_s0 = sld [smem:[#allocation15_spill]]  ;;  %s195_s11 = scalar_lea.vmem [#allocation2], %s644_s6 }
  0x1d   : > { %s203_s12 = sshll.u32 %s195_s11, 4  ;;  %p1106_p0 = pnand %p712_p13, %p1065_p4  ;;  %s1102_s12 = int_to_ptr.vmem [resolvable:$true] %s203_s12 }
  0x1e   : > { %s192_s14 = scalar_lea.sflag [#allocation3], %s1093_s5 }
  0x1f   : > { %p781_p3 = pneg %p1106_p0 }
  0x22   : > { %s1100_s10 = scalar_lea.hbm %s1363_s0, %s682_s7  ;;  %s784_s25 = scalar_lea.hbm %s1363_s0, 1024 }
  0x23   : > { %s779_s24 = scalar_lea.hbm %s1100_s10, 512  ;;  %p785_p4 = scmp.lt.u32.totalorder %s1100_s10, %s1363_s0 }
  0x24   : > { %p780_p2 = scmp.ne.s32.totalorder %s1100_s10, %s779_s24  ;;  %p786_p7 = scmp.lt.u32.totalorder %s784_s25, %s779_s24 }
  0x25   : > { %p788_p13 = scmp.lt.u32.totalorder %s779_s24, %s1100_s10 }
  0x26   : > { %p782_p5 = pnand %p781_p3, %p780_p2  ;;  %p787_p10 = por %p786_p7, %p785_p4 }
  0x28   : > { %p783_p6 = pneg %p782_p5  ;;  %p789_p12 = por %p788_p13, %p787_p10 }
  0x2a   : > { %p790_p1 = pnand %p789_p12, %p783_p6 }
  0x2c   : > { %793 = shalt.err (!%p790_p1)
}
  0x2d   : > { %s794_s9 = scalar_lea.vmem %s1102_s12, 512  ;;  %s987_s11 = smov [#allocation2]  }
  0x2e   : > { %p795_p2 = scmp.ne.s32.totalorder %s1102_s12, %s794_s9  ;;  %s799_s26 = sshll.u32 %s987_s11, 4  ;;  %s800_s26 = int_to_ptr.vmem [resolvable:$false] %s799_s26 }
  0x2f   : > { %s801_s6 = scalar_lea.vmem %s800_s26, 1024  ;;  %p802_p9 = scmp.lt.s32.totalorder %s1102_s12, %s800_s26 }
  0x30   : > { %p797_p5 = pnand %p795_p2, %p781_p3  ;;  %p803_p4 = scmp.lt.s32.totalorder %s801_s6, %s794_s9 }
  0x32   : > { %p798_p11 = pneg %p797_p5  ;;  %p804_p7 = por %p803_p4, %p802_p9 }
  0x34   : > { %p805_p10 = pnand %p804_p7, %p798_p11 }
  0x36   : > { %808 = shalt.err (!%p805_p10)
}
  0x37   : > { %s988_s24 = smov 128   ;;  %s989_s25 = smov 8  }
  0x38   : > { %698 = dma.hbm_to_vmem [thread:$0]  (!%p1106_p0), %s1100_s10, 512, %s1102_s12, %s192_s14, %s988_s24, %s988_s24, %s989_s25  }
  0x39   : > { %p230_p12 = scmp.lt.s32.totalorder %s985_s20, 3  ;;  %s647_s7 = sshll.u32 %s1093_s5, 3 }
  0x3a   : > { %s648_s8 = sshll.u32 %s981_s19, 7  ;;  %p1365_p9 = scmp.ge.s32.totalorder %s985_s20, 1 }
  0x3b   : > { %s1367_s1 = sld [smem:[#allocation16_spill]]  ;;  %s217_s22 = scalar_lea.vmem [#allocation5], %s647_s7 }
  0x3c   : > { %p1144_p11 = pnand %p1365_p9, %p230_p12  ;;  %s225_s0 = sshll.u32 %s217_s22, 4  ;;  %s226_s0 = int_to_ptr.vmem [resolvable:$true] %s225_s0 }
  0x3d   : > { %s214_s10 = scalar_lea.sflag [#allocation6], %s1093_s5 }
  0x3e   : > { %s1366_s9 = scalar_select %p1144_p11, 1, 0 }
  0x41   : > { %s1151_s6 = scalar_lea.hbm %s1367_s1, %s648_s8  ;;  %s814_s25 = scalar_lea.hbm %s1367_s1, 256 }
  0x42   : > { %s809_s12 = scalar_lea.hbm %s1151_s6, 128  ;;  %p815_p2 = scmp.lt.u32.totalorder %s1151_s6, %s1367_s1 }
  0x43   : > { %p810_p1 = scmp.ne.s32.totalorder %s1151_s6, %s809_s12  ;;  %p816_p5 = scmp.lt.u32.totalorder %s814_s25, %s809_s12 }
  0x44   : > { %p818_p7 = scmp.lt.u32.totalorder %s809_s12, %s1151_s6 }
  0x45   : > { %p812_p6 = pnand %p810_p1, %p781_p3  ;;  %p817_p4 = por %p816_p5, %p815_p2 }
  0x47   : > { %p813_p13 = pneg %p812_p6  ;;  %p819_p10 = por %p818_p7, %p817_p4 }
  0x49   : > { %p820_p12 = pnand %p819_p10, %p813_p13 }
  0x4b   : > { %823 = shalt.err (!%p820_p12)
}
  0x4c   : > { %s824_s22 = scalar_lea.vmem %s226_s0, 128  ;;  %s990_s5 = smov [#allocation5]  }
  0x4d   : > { %p825_p9 = scmp.ne.s32.totalorder %s226_s0, %s824_s22  ;;  %s829_s7 = sshll.u32 %s990_s5, 4  ;;  %s830_s7 = int_to_ptr.vmem [resolvable:$false] %s829_s7 }
  0x4e   : > { %s831_s26 = scalar_lea.vmem %s830_s7, 256  ;;  %p832_p8 = scmp.lt.s32.totalorder %s226_s0, %s830_s7 }
  0x4f   : > { %p827_p1 = pnand %p825_p9, %p781_p3  ;;  %p833_p11 = scmp.lt.s32.totalorder %s831_s26, %s824_s22 }
  0x51   : > { %p828_p6 = pneg %p827_p1  ;;  %p834_p2 = por %p833_p11, %p832_p8 }
  0x53   : > { %p835_p5 = pnand %p834_p2, %p828_p6 }
  0x55   : > { %838 = shalt.err (!%p835_p5)
}
  0x56   : > { %701 = dma.hbm_to_vmem [thread:$0]  (!%p1106_p0), %s1151_s6, 128, %s226_s0, %s214_s10  }
  0x57   : > { %p1368_p13 = scmp.ne.s32.totalorder %s1366_s9, 0 }
  0x58   : > { %s1176_s12 = sand.u32 (!%p1368_p13), 1, %s969_s16   ;;  %p1369_p8 = scmp.ne.s32.totalorder (!%p1368_p13), %s1360_s27, 0 }
  0x59   : > { %234 = sbr.rel (%p1368_p13) target bundleno = 214 (0xd6), region = 28  ;;  %s1179_s14 = sshll.u32 (!%p1368_p13), %s1176_s12, 5 }
  0x5a   : > { %s237_s24 = scalar_lea.sflag (!%p1368_p13), [#allocation3], %s1176_s12  ;;  %s240_s25 = scalar_lea.vmem (!%p1368_p13), [#allocation2], %s1179_s14 }
  0x60   : > { %948 = dma.done.wait (%p1369_p8), %s237_s24, 512  }
  0x61   : > { %950 = vsyncadd (%p1369_p8), %s237_s24, 4294966784  ;;  %s651_s0 = sshll.u32 %s1176_s12, 3  ;;  %s246_s13 = scalar_lea.sflag [#allocation6], %s1176_s12 }
  0x62   : > { %s249_s9 = scalar_lea.vmem [#allocation5], %s651_s0 }
  0x63   : > { %952 = dma.done.wait (%p1369_p8), %s246_s13, 128  }
  0x64   : > { %954 = vsyncadd (%p1369_p8), %s246_s13, 4294967168  ;;  %v302_v0 = vld [vmem:[%s240_s25] sm:$0xff]  ;;  %v303_v1 = vld [vmem:[%s240_s25 + $0x8] sm:$0xff]  ;;  %v991_v37 = vmov 0.0   ;;  %s1205_s27 = scalar_lea.vmem [#allocation10], %s651_s0  ;;  %s683_s8 = sshll.u32 %s977_s18, 9 }
  0x65   : > { %v304_v2 = vld [vmem:[%s240_s25 + $0x10] sm:$0xff]  ;;  %v305_v3 = vld [vmem:[%s240_s25 + $0x18] sm:$0xff]  ;;  %v310_v4 = vmax.f32 %v302_v0, %v303_v1  ;;  %v306_v20 = vld [vmem:[%s249_s9] sm:$0xff]  ;;  %s274_s11 = scalar_lea.vmem [#allocation7], %s1179_s14  ;;  %s1212_s5 = scalar_lea.vmem [#allocation8], %s1179_s14 }
  0x66   : > { %v311_v5 = vmax.f32 %v304_v2, %v305_v3  ;;  %vm335_vm0 = vcmp.eq.s32.totalorder %v306_v20, 0  ;;  %vm353_vm1 = vcmp.eq.s32.totalorder %v306_v20, 1  ;;  %vm373_vm2 = vcmp.eq.s32.totalorder %v306_v20, 2  ;;  %s443_s22 = sshll.u32 %s274_s11, 4  ;;  %s459_s7 = sshll.u32 %s1212_s5, 4  ;;  %s1220_s22 = int_to_ptr.vmem [resolvable:$true] %s443_s22  ;;  %s1228_s7 = int_to_ptr.vmem [resolvable:$true] %s459_s7 }
  0x67   : > { %v351_v23 = vsel %vm335_vm0, %v302_v0, 0.0  ;;  %v371_v24 = vsel %vm353_vm1, %v303_v1, 0.0  ;;  %v391_v26 = vsel %vm373_vm2, %v304_v2, 0.0  ;;  %vm393_vm3 = vcmp.eq.s32.totalorder %v306_v20, 3  ;;  %s1218_s25 = scalar_lea.hbm %s1351_s2, %s683_s8  ;;  %s1226_s9 = scalar_lea.hbm %s1352_s3, %s683_s8 }
  0x68   : > { %v312_v6 = vmax.f32 %v310_v4, %v311_v5  ;;  %v372_v25 = vadd.f32 %v371_v24, %v351_v23  ;;  %v411_v28 = vsel %vm393_vm3, %v305_v3, 0.0  ;;  %vm307_vm4 = vcmp.lt.s32.totalorder %v306_v20, 4  ;;  %s420_s26 = scalar_lea.sflag [#allocation4], %s1176_s12  ;;  %s839_s24 = scalar_lea.vmem %s1220_s22, 512 }
  0x69   : > { %v656_v38 = vsel %vm335_vm0, 1.0, %v991_v37  ;;  %v657_v39 = vsel %vm353_vm1, 1.0, %v991_v37  ;;  %v662_v40 = vsel %vm373_vm2, 1.0, %v991_v37  ;;  %v667_v41 = vsel %vm393_vm3, 1.0, %v991_v37  ;;  %p840_p0 = scmp.ne.s32.totalorder %s1220_s22, %s839_s24  ;;  %p1370_p3 = scmp.ne.s32.totalorder %s1361_s28, 0 }
  0x6a   : > { %v313_v7 = vsub.f32 %v302_v0, %v312_v6  ;;  %v314_v8 = vsub.f32 %v303_v1, %v312_v6  ;;  %v315_v9 = vsub.f32 %v304_v2, %v312_v6  ;;  %v316_v10 = vsub.f32 %v305_v3, %v312_v6  ;;  %s992_s10 = smov [#allocation7]  }
  0x6b   : > { %v392_v27 = vadd.f32 %v391_v26, %v372_v25  ;;  %v655_v47 = vsel %vm307_vm4, 1.0, %v991_v37  ;;  %p841_p11 = pnand %p840_p0, %p1370_p3  ;;  %s843_s0 = sshll.u32 %s992_s10, 4  ;;  %s844_s0 = int_to_ptr.vmem [resolvable:$false] %s843_s0 }
  0x6c   : > { %v317_v11 = vmul.f32 1.442695, %v313_v7  ;;  %v319_v12 = vmul.f32 1.442695, %v314_v8  ;;  %v321_v13 = vmul.f32 1.442695, %v315_v9  ;;  %p846_p7 = scmp.lt.s32.totalorder %s1220_s22, %s844_s0 }
  0x6d   : > { %v323_v14 = vmul.f32 1.442695, %v316_v10  ;;  %v412_v33 = vadd.f32 %v411_v28, %v392_v27  ;;  %p842_p4 = pneg %p841_p11  ;;  %s845_s6 = scalar_lea.vmem %s844_s0, 1024 }
  0x6e   : > { %767 = vpow2.f32 %v317_v11  ;;  %p847_p10 = scmp.lt.s32.totalorder %s845_s6, %s839_s24 }
  0x6f   : > { %769 = vpow2.f32 %v319_v12 }
  0x70   : > { %771 = vpow2.f32 %v321_v13  ;;  %p848_p12 = por %p847_p10, %p846_p7 }
  0x71   : > { %773 = vpow2.f32 %v323_v14 }
  0x72   : > { %p849_p9 = pnand %p848_p12, %p842_p4 }
  0x78   : > { %v768_v15 = vpop.eup %767 }
  0x79   : > { %v770_v16 = vpop.eup %769 }
  0x7a   : > { %v772_v17 = vpop.eup %771  ;;  %v325_v18 = vadd.f32 %v770_v16, %v768_v15 }
  0x7b   : > { %v774_v19 = vpop.eup %773 }
  0x7c   : > { %v326_v21 = vadd.f32 %v772_v17, %v325_v18 }
  0x7e   : > { %v327_v22 = vadd.f32 %v774_v19, %v326_v21 }
  0x80   : > { %775 = vrcp.f32 %v327_v22 }
  0x81   : > { %777 = vlog2.f32 %v327_v22 }
  0x8a   : > { %v776_v29 = vpop.eup %775 }
  0x8b   : > { %v778_v30 = vpop.eup %777  ;;  %v329_v31 = vmul.f32 %v776_v29, %v327_v22 }
  0x8c   : > { %v333_v32 = vmul.f32 0.6931472, %v778_v30 }
  0x8d   : > { %v330_v34 = vsub.f32 2.0, %v329_v31 }
  0x8e   : > { %v334_v35 = vadd.f32 %v333_v32, %v312_v6 }
  0x8f   : > { %v331_v36 = vmul.f32 %v776_v29, %v330_v34 }
  0x90   : > { %v414_v42 = vsub.f32 %v334_v35, %v412_v33 }
  0x91   : > { %v338_v43 = vmul.f32 %v768_v15, %v331_v36  ;;  %v356_v44 = vmul.f32 %v770_v16, %v331_v36  ;;  %v376_v45 = vmul.f32 %v772_v17, %v331_v36  ;;  %v396_v46 = vmul.f32 %v774_v19, %v331_v36 }
  0x92   : > { %v415_v48 = vsel %vm307_vm4, %v414_v42, 0.0 }
  0x93   : > { %v345_v49 = vmul.f32 %v338_v43, %v338_v43  ;;  %v365_v50 = vmul.f32 %v356_v44, %v356_v44  ;;  %v385_v51 = vmul.f32 %v376_v45, %v376_v45  ;;  %v405_v52 = vmul.f32 %v396_v46, %v396_v46 }
  0x94   : > { %v340_v53 = vmul.f32 %v656_v38, %v338_v43  ;;  %v359_v54 = vmul.f32 %v657_v39, %v356_v44  ;;  %v379_v55 = vmul.f32 %v662_v40, %v376_v45  ;;  %v399_v56 = vmul.f32 %v667_v41, %v396_v46 }
  0x95   : > { %v346_v57 = vmul.f32 %v655_v47, %v345_v49  ;;  %v366_v58 = vmul.f32 %v655_v47, %v365_v50  ;;  %v386_v59 = vmul.f32 %v655_v47, %v385_v51  ;;  %v406_v60 = vmul.f32 %v655_v47, %v405_v52 }
  0x96   : > { %343 = vst [vmem:[%s274_s11] sm:$0xff] %v340_v53  ;;  %659 = vst [vmem:[%s274_s11 + $0x8] sm:$0xff] %v359_v54 }
  0x97   : > { %v347_v61 = vadd.f32 %v656_v38, %v346_v57  ;;  %v367_v62 = vadd.f32 %v657_v39, %v366_v58  ;;  %v387_v63 = vadd.f32 %v662_v40, %v386_v59  ;;  %v407_v0 = vadd.f32 %v667_v41, %v406_v60  ;;  %664 = vst [vmem:[%s274_s11 + $0x10] sm:$0xff] %v379_v55 }
  0x98   : > { %669 = vst [vmem:[%s274_s11 + $0x18] sm:$0xff] %v399_v56 }
  0x99   : > { %852 = shalt.err (!%p849_p9)
}
  0x9a   : > { %s853_s8 = scalar_lea.hbm %s1218_s25, 512  ;;  %s857_s10 = scalar_lea.hbm %s1351_s2, 1024 }
  0x9b   : > { %p854_p1 = scmp.ne.s32.totalorder %s1218_s25, %s853_s8  ;;  %p858_p5 = scmp.lt.u32.totalorder %s1218_s25, %s1351_s2 }
  0x9c   : > { %p859_p13 = scmp.lt.u32.totalorder %s857_s10, %s853_s8  ;;  %p861_p0 = scmp.lt.u32.totalorder %s853_s8, %s1218_s25 }
  0x9d   : > { %p855_p6 = pnand %p854_p1, %p1370_p3 }
  0x9e   : > { %p860_p8 = por %p859_p13, %p858_p5 }
  0x9f   : > { %p856_p2 = pneg %p855_p6 }
  0xa0   : > { %p862_p11 = por %p861_p0, %p860_p8 }
  0xa2   : > { %p863_p4 = pnand %p862_p11, %p856_p2 }
  0xa4   : > { %866 = shalt.err (!%p863_p4)
}
  0xa5   : > { %s993_s6 = smov 128   ;;  %s994_s24 = smov 8   ;;  %418 = vst [vmem:[%s1205_s27] sm:$0xff] %v415_v48  ;;  %350 = vst [vmem:[%s1212_s5] sm:$0xff] %v347_v61 }
  0xa6   : > { %689 = dma.vmem_to_hbm [thread:$0]  (%p1370_p3), %s1220_s22, 512, %s1218_s25, %s420_s26, %s993_s6, %s993_s6, %s994_s24  }
  0xa7   : > { %s1371_s8 = sshll.u32 %s1205_s27, 4  ;;  %s1372_s11 = sshll.u32 %s977_s18, 7  ;;  %661 = vst [vmem:[%s1212_s5 + $0x8] sm:$0xff] %v367_v62  ;;  %666 = vst [vmem:[%s1212_s5 + $0x10] sm:$0xff] %v387_v63  ;;  %s1259_s8 = int_to_ptr.vmem [resolvable:$true] %s1371_s8 }
  0xa8   : > { %s1267_s13 = scalar_lea.hbm %s1353_s4, %s1372_s11  ;;  %671 = vst [vmem:[%s1212_s5 + $0x18] sm:$0xff] %v407_v0  ;;  %s1373_s0 = sand.u32 1, %s1053_s21  }
  0xa9   : > { %s1275_s1 = scalar_lea.sflag [#allocation9], %s1373_s0  ;;  %s867_s12 = scalar_lea.vmem %s1228_s7, 512 }
  0xaa   : > { %p868_p7 = scmp.ne.s32.totalorder %s1228_s7, %s867_s12  ;;  %s995_s22 = smov [#allocation8]  }
  0xab   : > { %s871_s27 = sshll.u32 %s995_s22, 4  ;;  %s872_s27 = int_to_ptr.vmem [resolvable:$false] %s871_s27 }
  0xac   : > { %p869_p10 = pnand %p868_p7, %p1370_p3  ;;  %s873_s18 = scalar_lea.vmem %s872_s27, 1024 }
  0xad   : > { %p874_p9 = scmp.lt.s32.totalorder %s1228_s7, %s872_s27  ;;  %p875_p1 = scmp.lt.s32.totalorder %s873_s18, %s867_s12 }
  0xae   : > { %p870_p12 = pneg %p869_p10 }
  0xaf   : > { %p876_p6 = por %p875_p1, %p874_p9 }
  0xb1   : > { %p877_p2 = pnand %p876_p6, %p870_p12 }
  0xb3   : > { %880 = shalt.err (!%p877_p2)
}
  0xb4   : > { %s881_s21 = scalar_lea.hbm %s1226_s9, 512  ;;  %s885_s26 = scalar_lea.hbm %s1352_s3, 1024 }
  0xb5   : > { %p882_p5 = scmp.ne.s32.totalorder %s1226_s9, %s881_s21  ;;  %p886_p0 = scmp.lt.u32.totalorder %s1226_s9, %s1352_s3 }
  0xb6   : > { %p887_p11 = scmp.lt.u32.totalorder %s885_s26, %s881_s21  ;;  %p889_p7 = scmp.lt.u32.totalorder %s881_s21, %s1226_s9 }
  0xb7   : > { %p883_p13 = pnand %p882_p5, %p1370_p3 }
  0xb8   : > { %p888_p4 = por %p887_p11, %p886_p0 }
  0xb9   : > { %p884_p8 = pneg %p883_p13 }
  0xba   : > { %p890_p10 = por %p889_p7, %p888_p4 }
  0xbc   : > { %p891_p12 = pnand %p890_p10, %p884_p8 }
  0xbe   : > { %894 = shalt.err (!%p891_p12)
}
  0xbf   : > { %690 = dma.vmem_to_hbm [thread:$0]  (%p1370_p3), %s1228_s7, 512, %s1226_s9, %s1275_s1, %s993_s6, %s993_s6, %s994_s24  }
  0xc0   : > { %s895_s10 = scalar_lea.vmem %s1259_s8, 128  ;;  %s996_s0 = smov [#allocation10]  }
  0xc1   : > { %p896_p9 = scmp.ne.s32.totalorder %s1259_s8, %s895_s10  ;;  %s899_s12 = sshll.u32 %s996_s0, 4  ;;  %s900_s12 = int_to_ptr.vmem [resolvable:$false] %s899_s12 }
  0xc2   : > { %s901_s22 = scalar_lea.vmem %s900_s12, 256  ;;  %p902_p2 = scmp.lt.s32.totalorder %s1259_s8, %s900_s12 }
  0xc3   : > { %p897_p1 = pnand %p896_p9, %p1370_p3  ;;  %p903_p5 = scmp.lt.s32.totalorder %s901_s22, %s895_s10 }
  0xc5   : > { %p898_p6 = pneg %p897_p1  ;;  %p904_p13 = por %p903_p5, %p902_p2 }
  0xc7   : > { %p905_p8 = pnand %p904_p13, %p898_p6 }
  0xc9   : > { %908 = shalt.err (!%p905_p8)
}
  0xca   : > { %s909_s7 = scalar_lea.hbm %s1267_s13, 128  ;;  %s913_s24 = scalar_lea.hbm %s1353_s4, 256 }
  0xcb   : > { %p910_p0 = scmp.ne.s32.totalorder %s1267_s13, %s909_s7  ;;  %p914_p7 = scmp.lt.u32.totalorder %s1267_s13, %s1353_s4 }
  0xcc   : > { %p915_p10 = scmp.lt.u32.totalorder %s913_s24, %s909_s7  ;;  %p917_p9 = scmp.lt.u32.totalorder %s909_s7, %s1267_s13 }
  0xcd   : > { %p911_p11 = pnand %p910_p0, %p1370_p3 }
  0xce   : > { %p916_p12 = por %p915_p10, %p914_p7 }
  0xcf   : > { %p912_p4 = pneg %p911_p11 }
  0xd0   : > { %p918_p1 = por %p917_p9, %p916_p12 }
  0xd2   : > { %p919_p6 = pnand %p918_p1, %p912_p4 }
  0xd4   : > { %922 = shalt.err (!%p919_p6)
}
  0xd5   : > { %691 = dma.vmem_to_hbm [thread:$0]  (%p1370_p3), %s1259_s8, 128, %s1267_s13, %s1275_s1  }
  0xd6 PF: > { %s487_s21 = sand.u32 1, %s965_s15   ;;  %p1374_p2 = scmp.ne.s32.totalorder %s1362_s30, 0 }
  0xd7   : > { %p1375_p5 = scmp.ge.s32.totalorder %s985_s20, 2  ;;  %s488_s5 = scalar_lea.sflag [#allocation4], %s487_s21 }
  0xd9   : > { %p703_p13 = pnand %p1375_p5, %p1374_p2 }
  0xdb   : > { %956 = dma.done.wait (!%p703_p13), %s488_s5, 512  }
  0xdc   : > { %958 = vsyncadd (!%p703_p13), %s488_s5, 4294966784  ;;  %s1376_s25 = sadd.s32 4294967294, %s985_s20  }
  0xdd   : > { %s496_s26 = sand.u32 1, %s1376_s25  }
  0xde   : > { %s497_s11 = scalar_lea.sflag [#allocation9], %s496_s26 }
  0xdf   : > { %960 = dma.done.wait (!%p703_p13), %s497_s11, 640  }
  0xe0   : > { %962 = vsyncadd (!%p703_p13), %s497_s11, 4294966656  ;;  %s27_s20 = sadd.s32 1, %s985_s20   ;;  %s1377_s15 = smov %s969_s16 }
  0xe1   : > { %p24_p3 = scmp.ge.s32.totalorder %s27_s20, 4   ;;  %s1378_s16 = smov %s973_s17 }
  0xe2   : > { %s1379_s17 = smov %s1084_s29  ;;  %s1380_s18 = smov %s981_s19 }
  0xe3   : > { %s1381_s19 = smov %s1383_s23  ;;  %26 = sbr.rel (!%p24_p3) target bundleno = 13 (0xd), region = 128 }
  0xea   :  { %511 = vsyncpa [#allocation3], 1 }
  0xeb   :  { %513 = vsyncpa [#allocation3 + $0x1], 1 }
  0xec   :  { %514 = vsyncpa [#allocation6], 1 }
  0xed   :  { %516 = vsyncpa [#allocation6 + $0x1], 1 }
  0xee   :  { %517 = vsyncpa [#allocation4], 1 }
  0xef   :  { %519 = vsyncpa [#allocation4 + $0x1], 1 }
  0xf0   :  { %520 = vsyncpa [#allocation9], 1 }
  0xf1   :  { %522 = vsyncpa [#allocation9 + $0x1], 1 }

</bundles_post_ra>
